<compile_context>
chip_gen: v7x
topology: tpu7x:2x2x1
jax: 0.10.0
libtpu: 0.0.40
codegen_flags: <defaults>
</compile_context>

<pallas_src>
import jax
import jax.numpy as jnp
from jax import lax
from jax.experimental import pallas as pl
from jax.experimental.pallas import tpu as pltpu


# ----------------------------- Pallas kernel --------------------------------
def _make_kernel(*, eps, tq, hidden, seq_len, has_tt, tt_count):
    """Fused word-gather + add + LayerNorm kernel body."""

    def kernel(ids_ref, *refs):
        if has_tt:
            (pos_ref, tt_ids_ref, tt_tab_ref, gamma_ref, beta_ref,
             wemb_ref, out_ref, we_buf, sem) = refs
        else:
            (pos_ref, gamma_ref, beta_ref,
             wemb_ref, out_ref, we_buf, sem) = refs
            tt_ids_ref = tt_tab_ref = None

        j = pl.program_id(0)          # sequence-tile index (outer, "parallel")
        b = pl.program_id(1)          # batch index (inner, "arbitrary")
        nb = pl.num_programs(1)
        base = j * tq
        slot = b & 1

        # Issue the per-row gather DMAs for batch element `batch_idx` of this
        # sequence tile into buffer slot `to_slot` (word_emb stays in HBM).
        def start_gather(batch_idx, to_slot):
            def body(r, carry):
                p = jnp.minimum(base + r, seq_len - 1)     # clamp epilogue tile
                row = ids_ref[batch_idx * seq_len + p]
                pltpu.make_async_copy(wemb_ref.at[row],
                                      we_buf.at[to_slot, r],
                                      sem.at[to_slot]).start()
                return carry
            lax.fori_loop(0, tq, body, 0)

        # First batch element of this tile: nothing has been prefetched yet.
        @pl.when(b == 0)
        def _():
            start_gather(0, 0)

        # Double-buffer: prefetch the next batch element's rows while we
        # consume the current ones (state never crosses a j boundary).
        @pl.when(b + 1 < nb)
        def _():
            start_gather(b + 1, 1 - slot)

        # Wait for the tq row copies of the current slot.
        def wait_body(r, carry):
            pltpu.make_async_copy(wemb_ref.at[0],
                                  we_buf.at[slot, r],
                                  sem.at[slot]).wait()
            return carry
        lax.fori_loop(0, tq, wait_body, 0)

        # ----- sum of embeddings (f32 accumulate) ---------------------------
        x = we_buf[slot].astype(jnp.float32) + pos_ref[...].astype(jnp.float32)

        if has_tt:
            tt_ids = tt_ids_ref[...]                         # (tq, 1) int32
            tab = tt_tab_ref[...].astype(jnp.float32)        # (T, H)
            tt = jnp.zeros_like(x)
            for k in range(tt_count):                        # T is tiny (e.g. 2)
                sel = jnp.broadcast_to(tt_ids == k, x.shape)
                row = jnp.broadcast_to(tab[k:k + 1, :], x.shape)
                tt = jnp.where(sel, row, tt)
            x = x + tt

        # ----- LayerNorm over hidden dim (one-pass statistics) --------------
        inv_h = 1.0 / float(hidden)
        mean = jnp.sum(x, axis=-1, keepdims=True) * inv_h
        msq = jnp.sum(x * x, axis=-1, keepdims=True) * inv_h
        var = jnp.maximum(msq - mean * mean, 0.0)
        inv = lax.rsqrt(var + eps)
        y = ((x - mean) * inv) * gamma_ref[...].astype(jnp.float32) \
            + beta_ref[...].astype(jnp.float32)

        # Dropout: inference-mode identity.
        # TODO(synk): training-mode dropout (pltpu.prng_seed / prng_random_bits).
        out_ref[...] = y.astype(out_ref.dtype)

    return kernel


# ----------------------------- wrapper ---------------------------------------
def text_embeddings(input_ids, word_emb, pos_emb, tt_emb, gamma, beta, *,
                    token_type_ids=None, position_ids=None,
                    eps=1e-12, row_tile=512):
    """Pallas implementation of TextEmbeddings.forward (eval mode).

    input_ids: (B, S) int32
    word_emb:  (V, H)     pos_emb: (P, H)     tt_emb: (T, H)
    gamma/beta: (H,)
    returns:   (B, S, H) in word_emb.dtype
    """
    B, S = input_ids.shape
    V, H = word_emb.shape
    out_dtype = word_emb.dtype
    has_tt = token_type_ids is not None

    # --- position (+ default token-type) slab --------------------------------
    if position_ids is None:
        if S > pos_emb.shape[0]:
            raise ValueError(
                f"seq_len={S} exceeds max_position_embeddings={pos_emb.shape[0]}")
        pos_slab = pos_emb[:S]                                # (S, H) contiguous rows
    else:
        pid = jnp.asarray(position_ids, jnp.int32)
        if pid.ndim == 2 and pid.shape[0] == 1:
            pid = pid[0]
        pos_slab = jnp.take(pos_emb, pid, axis=0)             # (S, H) or (B, S, H)

    if not has_tt:
        # Default token types are all zero -> fold row 0 into the position slab
        # (f32 fold; the 2-D slab is tiny and read once thanks to the grid order).
        pos_slab = pos_slab.astype(jnp.float32) + tt_emb[0].astype(jnp.float32)
        if pos_slab.ndim == 3:
            pos_slab = pos_slab.astype(pos_emb.dtype)         # keep big slabs narrow

    # --- tile size: sublane-rounded, VMEM-budgeted ----------------------------
    emb_b = jnp.dtype(word_emb.dtype).itemsize
    pos_b = jnp.dtype(pos_slab.dtype).itemsize
    out_b = jnp.dtype(out_dtype).itemsize
    # per-row VMEM bytes: 2x pos + 2x out (double-buffered streams), 2x gather
    # scratch, ~2 f32 LayerNorm temporaries.
    per_row = H * (2 * pos_b + 2 * out_b + 2 * emb_b + 2 * 4) + 64
    budget = 24 << 20
    cap_rows = max(1, budget // per_row)
    sub = {1: 32, 2: 16}.get(out_b, 8)        # dtype-native sublane multiple
    if S <= sub:
        tq = S
    else:
        tq = min(int(row_tile), cap_rows, S)
        tq = max(sub, (tq // sub) * sub)
    grid = (pl.cdiv(S, tq), B)                # batch innermost -> pos re-DMA elided

    # --- specs ----------------------------------------------------------------
    in_specs = []
    operands = []
    if pos_slab.ndim == 2:
        in_specs.append(pl.BlockSpec((tq, H), lambda j, b, ids: (j, 0)))
    else:
        in_specs.append(pl.BlockSpec((None, tq, H), lambda j, b, ids: (b, j, 0)))
    operands.append(pos_slab)

    if has_tt:
        tt_ids3 = jnp.broadcast_to(jnp.asarray(token_type_ids, jnp.int32),
                                   (B, S)).reshape(B, S, 1)
        in_specs.append(pl.BlockSpec((None, tq, 1), lambda j, b, ids: (b, j, 0)))
        operands.append(tt_ids3)
        in_specs.append(pl.BlockSpec((tt_emb.shape[0], H),
                                     lambda j, b, ids: (0, 0)))
        operands.append(tt_emb)

    in_specs.append(pl.BlockSpec((1, H), lambda j, b, ids: (0, 0)))
    operands.append(gamma.reshape(1, H))
    in_specs.append(pl.BlockSpec((1, H), lambda j, b, ids: (0, 0)))
    operands.append(beta.reshape(1, H))

    # Word-embedding table: stays in HBM, gathered by in-kernel row DMAs.
    in_specs.append(pl.BlockSpec(memory_space=pl.ANY))
    operands.append(word_emb)

    out_spec = pl.BlockSpec((None, tq, H), lambda j, b, ids: (b, j, 0))

    kernel = _make_kernel(eps=float(eps), tq=tq, hidden=H, seq_len=S,
                          has_tt=has_tt, tt_count=int(tt_emb.shape[0]))

    vmem_limit = int(min(max(2 * tq * per_row, 32 << 20), 64 << 20))
    ids_flat = input_ids.reshape(B * S).astype(jnp.int32)

    out = pl.pallas_call(
        kernel,
        out_shape=jax.ShapeDtypeStruct((B, S, H), out_dtype),
        grid_spec=pltpu.PrefetchScalarGridSpec(
            num_scalar_prefetch=1,
            grid=grid,
            in_specs=in_specs,
            out_specs=out_spec,
            scratch_shapes=[
                pltpu.VMEM((2, tq, H), word_emb.dtype),   # gather double-buffer
                pltpu.SemaphoreType.DMA((2,)),            # one DMA sem per slot
            ]),
        compiler_params=pltpu.CompilerParams(
            dimension_semantics=("parallel", "arbitrary"),
            vmem_limit_bytes=vmem_limit),
    )(ids_flat, *operands)

    return out


# ----------------------------- reference (plain JAX) ------------------------
def text_embeddings_ref(input_ids, word_emb, pos_emb, tt_emb, gamma, beta, eps,
                        token_type_ids=None, position_ids=None):
    B, S = input_ids.shape
    if position_ids is None:
        position_ids = jnp.broadcast_to(jnp.arange(S)[None, :], (B, S))
    else:
        position_ids = jnp.broadcast_to(jnp.asarray(position_ids, jnp.int32), (B, S))
    if token_type_ids is None:
        token_type_ids = jnp.zeros((B, S), dtype=jnp.int32)
    x = word_emb[input_ids] + tt_emb[token_type_ids] + pos_emb[position_ids]
    x = x.astype(jnp.float32)
    mean = jnp.mean(x, axis=-1, keepdims=True)
    var = jnp.mean((x - mean) ** 2, axis=-1, keepdims=True)
    return (x - mean) * lax.rsqrt(var + eps) * gamma + beta


# ----------------------------- main ------------------------------------------
if __name__ == "__main__":
    EPS = 1e-12
    key = jax.random.PRNGKey(0)

    # ---- case 1: default path (position_ids / token_type_ids = None) --------
    VOCAB, HIDDEN, MAX_POS, TYPE_VOCAB, PAD_TOKEN_ID = 64, 128, 32, 2, 0
    B, S = 2, 16
    k_w, k_p, k_t, k_g, k_b, k_ids, key = jax.random.split(key, 7)
    word_emb = jax.random.normal(k_w, (VOCAB, HIDDEN), jnp.float32) * 0.02
    word_emb = word_emb.at[PAD_TOKEN_ID].set(0.0)   # padding_idx row zero-init
    pos_emb = jax.random.normal(k_p, (MAX_POS, HIDDEN), jnp.float32) * 0.02
    tt_emb = jax.random.normal(k_t, (TYPE_VOCAB, HIDDEN), jnp.float32) * 0.02
    gamma = 1.0 + 0.1 * jax.random.normal(k_g, (HIDDEN,), jnp.float32)
    beta = 0.1 * jax.random.normal(k_b, (HIDDEN,), jnp.float32)
    input_ids = jax.random.randint(k_ids, (B, S), 0, VOCAB, dtype=jnp.int32)

    out = text_embeddings(input_ids, word_emb, pos_emb, tt_emb, gamma, beta,
                          eps=EPS, row_tile=8)      # 2 seq tiles x 2 batch steps
    out = jax.block_until_ready(out)
    ref = text_embeddings_ref(input_ids, word_emb, pos_emb, tt_emb, gamma, beta, EPS)
    assert out.shape == (B, S, HIDDEN)
    assert jnp.allclose(out, ref, atol=1e-5, rtol=1e-5), "case1 mismatch vs reference"

    # ---- case 2: explicit token_type_ids + explicit position_ids ------------
    VOCAB2, HIDDEN2, MAX_POS2, TYPE_VOCAB2 = 96, 256, 64, 2
    B2, S2 = 2, 32
    k_w, k_p, k_t, k_g, k_b, k_ids, k_tt, k_pid, key = jax.random.split(key, 9)
    word_emb2 = jax.random.normal(k_w, (VOCAB2, HIDDEN2), jnp.float32) * 0.02
    pos_emb2 = jax.random.normal(k_p, (MAX_POS2, HIDDEN2), jnp.float32) * 0.02
    tt_emb2 = jax.random.normal(k_t, (TYPE_VOCAB2, HIDDEN2), jnp.float32) * 0.02
    gamma2 = 1.0 + 0.1 * jax.random.normal(k_g, (HIDDEN2,), jnp.float32)
    beta2 = 0.1 * jax.random.normal(k_b, (HIDDEN2,), jnp.float32)
    input_ids2 = jax.random.randint(k_ids, (B2, S2), 0, VOCAB2, dtype=jnp.int32)
    token_type_ids2 = jax.random.randint(k_tt, (B2, S2), 0, TYPE_VOCAB2, dtype=jnp.int32)
    position_ids2 = jax.random.randint(k_pid, (B2, S2), 0, MAX_POS2, dtype=jnp.int32)

    out2 = text_embeddings(input_ids2, word_emb2, pos_emb2, tt_emb2, gamma2, beta2,
                           token_type_ids=token_type_ids2,
                           position_ids=position_ids2,
                           eps=EPS, row_tile=16)
    out2 = jax.block_until_ready(out2)
    ref2 = text_embeddings_ref(input_ids2, word_emb2, pos_emb2, tt_emb2, gamma2, beta2,
                               EPS, token_type_ids=token_type_ids2,
                               position_ids=position_ids2)
    assert out2.shape == (B2, S2, HIDDEN2)
    assert jnp.allclose(out2, ref2, atol=1e-5, rtol=1e-5), "case2 mismatch vs reference"

    print("KERNEL_OK")
</pallas_src>

<mosaic_0001>
module attributes {stable_mosaic.version = 11 : i64} {
  func.func @kernel(%arg0: i32, %arg1: i32, %arg2: memref<32xi32, #tpu.memory_space<smem>>, %arg3: memref<8x128xf32, #tpu.memory_space<vmem>>, %arg4: memref<1x128xf32, #tpu.memory_space<vmem>>, %arg5: memref<1x128xf32, #tpu.memory_space<vmem>>, %arg6: memref<64x128xf32, #tpu.memory_space<any>>, %arg7: memref<1x8x128xf32, #tpu.memory_space<vmem>>, %arg8: memref<2x8x128xf32, #tpu.memory_space<vmem>>, %arg9: memref<2x!tpu.dma_semaphore, #tpu.memory_space<semaphore_mem>>) attributes {dimension_semantics = [#tpu.dimension_semantics<parallel>, #tpu.dimension_semantics<arbitrary>], iteration_bounds = array<i64: 2, 2>, scalar_prefetch = 1 : i64, scratch_operands = 2 : i64, tpu.core_type = #tpu.core_type<tc>, window_params = [{transform_indices = @transform_0, window_bounds = array<i64: 8, 128>}, {pipeline_mode = #tpu.pipeline_mode<synchronous>, transform_indices = @transform_1, window_bounds = array<i64: 1, 128>}, {pipeline_mode = #tpu.pipeline_mode<synchronous>, transform_indices = @transform_2, window_bounds = array<i64: 1, 128>}, {}, {transform_indices = @transform_4, window_bounds = array<i64: 1, 8, 128>}]} {
    %c8_i32 = arith.constant 8 : i32
    %0 = arith.muli %arg0, %c8_i32 : i32
    %c1_i32 = arith.constant 1 : i32
    %1 = arith.andi %arg1, %c1_i32 : i32
    %c0_i32 = arith.constant 0 : i32
    %2 = arith.cmpi eq, %arg1, %c0_i32 : i32
    %3 = arith.extui %2 : i1 to i32
    %c0_i32_0 = arith.constant 0 : i32
    %4 = arith.cmpi ne, %3, %c0_i32_0 : i32
    scf.if %4 {
      %c0_i32_22 = arith.constant 0 : i32
      %c8_i32_23 = arith.constant 8 : i32
      %44 = arith.addi %c0_i32_22, %c8_i32_23 : i32
      %c1_i32_24 = arith.constant 1 : i32
      scf.for %arg10 = %c0_i32_22 to %44 step %c1_i32_24  : i32 {
        %45 = arith.addi %0, %arg10 : i32
        %c15_i32 = arith.constant 15 : i32
        %46 = arith.minsi %45, %c15_i32 : i32
        %c0_i32_26 = arith.constant 0 : i32
        %47 = arith.addi %c0_i32_26, %46 : i32
        %48 = arith.index_cast %47 : i32 to index
        %49 = memref.load %arg2[%48] : memref<32xi32, #tpu.memory_space<smem>>
        %c0_i32_27 = arith.constant 0 : i32
        %c0_i32_28 = arith.constant 0 : i32
        %c0_i32_29 = arith.constant 0 : i32
        %50 = tpu.memref_slice %arg6[%49, %c0_i32_29] : memref<64x128xf32, #tpu.memory_space<any>> -> memref<1x128xf32, #tpu.memory_space<any>>
        %51 = tpu.memref_squeeze %50 : memref<1x128xf32, #tpu.memory_space<any>> -> memref<128xf32, #tpu.memory_space<any>>
        %c0_i32_30 = arith.constant 0 : i32
        %52 = tpu.memref_slice %arg8[%c0_i32_27, %arg10, %c0_i32_30] : memref<2x8x128xf32, #tpu.memory_space<vmem>> -> memref<1x1x128xf32, #tpu.memory_space<vmem>>
        %53 = tpu.memref_squeeze %52 : memref<1x1x128xf32, #tpu.memory_space<vmem>> -> memref<128xf32, #tpu.memory_space<vmem>>
        %54 = tpu.memref_slice %arg9[%c0_i32_28] : memref<2x!tpu.dma_semaphore, #tpu.memory_space<semaphore_mem>> -> memref<1x!tpu.dma_semaphore, #tpu.memory_space<semaphore_mem>>
        %55 = tpu.memref_squeeze %54 : memref<1x!tpu.dma_semaphore, #tpu.memory_space<semaphore_mem>> -> memref<!tpu.dma_semaphore, #tpu.memory_space<semaphore_mem>>
        tpu.enqueue_dma source(%51 : memref<128xf32, #tpu.memory_space<any>>) target(%53 : memref<128xf32, #tpu.memory_space<vmem>>) target_semaphore(%55 : memref<!tpu.dma_semaphore, #tpu.memory_space<semaphore_mem>>)
      }
      %c8_i32_25 = arith.constant 8 : i32
    } else {
    }
    %c1_i32_1 = arith.constant 1 : i32
    %5 = arith.addi %arg1, %c1_i32_1 : i32
    %c2_i32 = arith.constant 2 : i32
    %6 = arith.cmpi slt, %5, %c2_i32 : i32
    %7 = arith.extui %6 : i1 to i32
    %c0_i32_2 = arith.constant 0 : i32
    %8 = arith.cmpi ne, %7, %c0_i32_2 : i32
    scf.if %8 {
      %c1_i32_22 = arith.constant 1 : i32
      %44 = arith.addi %arg1, %c1_i32_22 : i32
      %c1_i32_23 = arith.constant 1 : i32
      %45 = arith.subi %c1_i32_23, %1 : i32
      %c0_i32_24 = arith.constant 0 : i32
      %c8_i32_25 = arith.constant 8 : i32
      %46 = arith.addi %c0_i32_24, %c8_i32_25 : i32
      %c1_i32_26 = arith.constant 1 : i32
      scf.for %arg10 = %c0_i32_24 to %46 step %c1_i32_26  : i32 {
        %47 = arith.addi %0, %arg10 : i32
        %c15_i32 = arith.constant 15 : i32
        %48 = arith.minsi %47, %c15_i32 : i32
        %c16_i32 = arith.constant 16 : i32
        %49 = arith.muli %44, %c16_i32 : i32
        %50 = arith.addi %49, %48 : i32
        %51 = arith.index_cast %50 : i32 to index
        %52 = memref.load %arg2[%51] : memref<32xi32, #tpu.memory_space<smem>>
        %c0_i32_28 = arith.constant 0 : i32
        %53 = tpu.memref_slice %arg6[%52, %c0_i32_28] : memref<64x128xf32, #tpu.memory_space<any>> -> memref<1x128xf32, #tpu.memory_space<any>>
        %54 = tpu.memref_squeeze %53 : memref<1x128xf32, #tpu.memory_space<any>> -> memref<128xf32, #tpu.memory_space<any>>
        %c0_i32_29 = arith.constant 0 : i32
        %55 = tpu.memref_slice %arg8[%45, %arg10, %c0_i32_29] : memref<2x8x128xf32, #tpu.memory_space<vmem>> -> memref<1x1x128xf32, #tpu.memory_space<vmem>>
        %56 = tpu.memref_squeeze %55 : memref<1x1x128xf32, #tpu.memory_space<vmem>> -> memref<128xf32, #tpu.memory_space<vmem>>
        %57 = tpu.memref_slice %arg9[%45] : memref<2x!tpu.dma_semaphore, #tpu.memory_space<semaphore_mem>> -> memref<1x!tpu.dma_semaphore, #tpu.memory_space<semaphore_mem>>
        %58 = tpu.memref_squeeze %57 : memref<1x!tpu.dma_semaphore, #tpu.memory_space<semaphore_mem>> -> memref<!tpu.dma_semaphore, #tpu.memory_space<semaphore_mem>>
        tpu.enqueue_dma source(%54 : memref<128xf32, #tpu.memory_space<any>>) target(%56 : memref<128xf32, #tpu.memory_space<vmem>>) target_semaphore(%58 : memref<!tpu.dma_semaphore, #tpu.memory_space<semaphore_mem>>)
      }
      %c8_i32_27 = arith.constant 8 : i32
    } else {
    }
    %c0_i32_3 = arith.constant 0 : i32
    %c8_i32_4 = arith.constant 8 : i32
    %9 = arith.addi %c0_i32_3, %c8_i32_4 : i32
    %c1_i32_5 = arith.constant 1 : i32
    scf.for %arg10 = %c0_i32_3 to %9 step %c1_i32_5  : i32 {
      %c0_i32_22 = arith.constant 0 : i32
      %c0_i32_23 = arith.constant 0 : i32
      %44 = tpu.memref_slice %arg6[%c0_i32_22, %c0_i32_23] : memref<64x128xf32, #tpu.memory_space<any>> -> memref<1x128xf32, #tpu.memory_space<any>>
      %45 = tpu.memref_squeeze %44 : memref<1x128xf32, #tpu.memory_space<any>> -> memref<128xf32, #tpu.memory_space<any>>
      %c0_i32_24 = arith.constant 0 : i32
      %46 = tpu.memref_slice %arg8[%1, %arg10, %c0_i32_24] : memref<2x8x128xf32, #tpu.memory_space<vmem>> -> memref<1x1x128xf32, #tpu.memory_space<vmem>>
      %47 = tpu.memref_squeeze %46 : memref<1x1x128xf32, #tpu.memory_space<vmem>> -> memref<128xf32, #tpu.memory_space<vmem>>
      %48 = tpu.memref_slice %arg9[%1] : memref<2x!tpu.dma_semaphore, #tpu.memory_space<semaphore_mem>> -> memref<1x!tpu.dma_semaphore, #tpu.memory_space<semaphore_mem>>
      %49 = tpu.memref_squeeze %48 : memref<1x!tpu.dma_semaphore, #tpu.memory_space<semaphore_mem>> -> memref<!tpu.dma_semaphore, #tpu.memory_space<semaphore_mem>>
      tpu.wait_dma2 semaphore(%49 : memref<!tpu.dma_semaphore, #tpu.memory_space<semaphore_mem>>) src(%45 : memref<128xf32, #tpu.memory_space<any>>) dst(%47 : memref<128xf32, #tpu.memory_space<vmem>>)
    }
    %c8_i32_6 = arith.constant 8 : i32
    %10 = arith.index_cast %1 : i32 to index
    %c0 = arith.constant 0 : index
    %c0_7 = arith.constant 0 : index
    %11 = vector.load %arg8[%10, %c0, %c0_7] : memref<2x8x128xf32, #tpu.memory_space<vmem>>, vector<1x8x128xf32>
    %12 = vector.shape_cast %11 : vector<1x8x128xf32> to vector<8x128xf32>
    %c0_8 = arith.constant 0 : index
    %c0_9 = arith.constant 0 : index
    %13 = vector.load %arg3[%c0_8, %c0_9] : memref<8x128xf32, #tpu.memory_space<vmem>>, vector<8x128xf32>
    %14 = arith.addf %12, %13 : vector<8x128xf32>
    %cst = arith.constant dense<0.000000e+00> : vector<8xf32>
    %15 = vector.multi_reduction <add>, %14, %cst [1] : vector<8x128xf32> to vector<8xf32>
    %16 = vector.shape_cast %15 : vector<8xf32> to vector<8x1xf32>
    %cst_10 = arith.constant 7.812500e-03 : f32
    %17 = vector.broadcast %cst_10 : f32 to vector<8x1xf32>
    %18 = arith.mulf %16, %17 : vector<8x1xf32>
    %19 = arith.mulf %14, %14 : vector<8x128xf32>
    %cst_11 = arith.constant dense<0.000000e+00> : vector<8xf32>
    %20 = vector.multi_reduction <add>, %19, %cst_11 [1] : vector<8x128xf32> to vector<8xf32>
    %21 = vector.shape_cast %20 : vector<8xf32> to vector<8x1xf32>
    %cst_12 = arith.constant 7.812500e-03 : f32
    %22 = vector.broadcast %cst_12 : f32 to vector<8x1xf32>
    %23 = arith.mulf %21, %22 : vector<8x1xf32>
    %24 = arith.mulf %18, %18 : vector<8x1xf32>
    %25 = arith.subf %23, %24 : vector<8x1xf32>
    %cst_13 = arith.constant 0.000000e+00 : f32
    %26 = vector.broadcast %cst_13 : f32 to vector<8x1xf32>
    %27 = arith.maximumf %25, %26 : vector<8x1xf32>
    %cst_14 = arith.constant 9.99999996E-13 : f32
    %28 = vector.broadcast %cst_14 : f32 to vector<8x1xf32>
    %29 = arith.addf %27, %28 : vector<8x1xf32>
    %30 = math.rsqrt %29 : vector<8x1xf32>
    %31 = vector.broadcast %18 : vector<8x1xf32> to vector<8x128xf32>
    %32 = arith.subf %14, %31 : vector<8x128xf32>
    %33 = vector.broadcast %30 : vector<8x1xf32> to vector<8x128xf32>
    %34 = arith.mulf %32, %33 : vector<8x128xf32>
    %c0_15 = arith.constant 0 : index
    %c0_16 = arith.constant 0 : index
    %35 = vector.load %arg4[%c0_15, %c0_16] : memref<1x128xf32, #tpu.memory_space<vmem>>, vector<1x128xf32>
    %36 = vector.broadcast %35 : vector<1x128xf32> to vector<8x128xf32>
    %37 = arith.mulf %34, %36 : vector<8x128xf32>
    %c0_17 = arith.constant 0 : index
    %c0_18 = arith.constant 0 : index
    %38 = vector.load %arg5[%c0_17, %c0_18] : memref<1x128xf32, #tpu.memory_space<vmem>>, vector<1x128xf32>
    %39 = vector.broadcast %38 : vector<1x128xf32> to vector<8x128xf32>
    %40 = arith.addf %37, %39 : vector<8x128xf32>
    %c0_19 = arith.constant 0 : index
    %c0_20 = arith.constant 0 : index
    %c0_21 = arith.constant 0 : index
    %41 = vector.load %arg7[%c0_19, %c0_20, %c0_21] : memref<1x8x128xf32, #tpu.memory_space<vmem>>, vector<1x8x128xf32>
    %42 = vector.shape_cast %41 : vector<1x8x128xf32> to vector<8x128xf32>
    %43 = vector.shape_cast %40 : vector<8x128xf32> to vector<1x8x128xf32>
    tpu.vector_store %arg7[%c0_19, %c0_20, %c0_21], %43 {strides = array<i32>} : memref<1x8x128xf32, #tpu.memory_space<vmem>>, vector<1x8x128xf32>,
    return
  }
  func.func @transform_0(%arg0: i32, %arg1: i32, %arg2: memref<32xi32, #tpu.memory_space<smem>>) -> (i32, i32) {
    %c0_i32 = arith.constant 0 : i32
    %c0_i32_0 = arith.constant 0 : i32
    return %arg0, %c0_i32 : i32, i32
  }
  func.func @transform_1(%arg0: i32, %arg1: i32, %arg2: memref<32xi32, #tpu.memory_space<smem>>) -> (i32, i32) {
    %c0_i32 = arith.constant 0 : i32
    %c0_i32_0 = arith.constant 0 : i32
    %c0_i32_1 = arith.constant 0 : i32
    return %c0_i32, %c0_i32_0 : i32, i32
  }
  func.func @transform_2(%arg0: i32, %arg1: i32, %arg2: memref<32xi32, #tpu.memory_space<smem>>) -> (i32, i32) {
    %c0_i32 = arith.constant 0 : i32
    %c0_i32_0 = arith.constant 0 : i32
    %c0_i32_1 = arith.constant 0 : i32
    return %c0_i32, %c0_i32_0 : i32, i32
  }
  func.func @transform_4(%arg0: i32, %arg1: i32, %arg2: memref<32xi32, #tpu.memory_space<smem>>) -> (i32, i32, i32) {
    %c0_i32 = arith.constant 0 : i32
    %c0_i32_0 = arith.constant 0 : i32
    return %arg1, %arg0, %c0_i32 : i32, i32, i32
  }
}

</mosaic_0001>

<bundles_post_ra>
// kernel: tpu_custom_call.1
= control target key start
LH: loop header
LB: loop body
LE: loop exit
PB: predicated region body
PF: predicated region fallthrough
CT: control target
= control target key end

     0   :  { %s1195_s0 = inlined_call_operand.hbm [shape: s32[32], index: 0, kind: input, shape index: {}]   ;;  %s1196_s1 = inlined_call_operand.hbm [shape: f32[16,128], index: 1, kind: input, shape index: {}]   ;;  %s1197_s2 = inlined_call_operand.vmem [shape: f32[1,128], index: 2, kind: input, shape index: {}]   ;;  %s1198_s3 = inlined_call_operand.vmem [shape: f32[1,128], index: 3, kind: input, shape index: {}]   ;;  %s1199_s4 = inlined_call_operand.hbm [shape: f32[64,128], index: 4, kind: input, shape index: {}]   ;;  %s1200_s5 = inlined_call_operand.hbm [shape: f32[2,16,128], index: 5, kind: output, shape index: {}]  }
   0x1   :  { %1215 = sst [smem:[#allocation32_spill]] %s1196_s1  ;;  %s612_s20 = scalar_lea.hbm %s1195_s0, 16 }
   0x2   :  { %p613_p0 = scmp.ne.s32.totalorder %s1195_s0, %s612_s20  ;;  %p616_p1 = scmp.lt.u32.totalorder %s612_s20, %s1195_s0 }
   0x4   :  { %p618_p2 = pnand %p616_p1, %p613_p0 }
   0x6   :  { %621 = shalt.err (!%p618_p2)  }
   0x7   :  { %s852_s25 = smov [#allocation5]  }
   0x8   :  { %11 = dma.hbm_to_smem %s1195_s0, 16, %s852_s25, [#allocation4] }
   0x9   :  { %784 = dma.done.wait [#allocation4], 16 }
   0xa   :  { %785 = vsyncadd [#allocation4], 4294967280 }
   0xb   :  { %13 = sfence }
   0xc   :  { %14 = vsyncpa [#allocation7], 0 }
   0xd   :  { %16 = vsyncpa [#allocation7 + $0x1], 0 }
   0xe   :  { %17 = vsyncpa [#allocation8], 0 }
   0xf   :  { %19 = vsyncpa [#allocation8 + $0x1], 0  ;;  %s899_s28 = smov 0   ;;  %s901_s29 = smov 0  }
  0x10   :  { %s903_s30 = smov 0   ;;  %s905_s6 = smov 0  }
  0x11   :  { %s907_s7 = smov 0   ;;  %s909_s8 = smov 0  }
  0x12   :  { %s911_s0 = smov 0   ;;  %s913_s9 = smov 0  }
  0x13   :  { %s915_s10 = smov 0   ;;  %s917_s11 = smov 0  }
  0x14   :  { %s919_s12 = smov 0  }
  0x15 LB: > { %1216 = sst [smem:[#allocation20_spill]] %s798_s28  ;;  %s455_s13 = sadd.s32 4294967295, %s838_s12   ;;  %s838_s12 = sphi %s919_s12, %s25_s12   ;;  %s834_s11 = sphi %s917_s11, %s1254_s11   ;;  %s830_s10 = sphi %s915_s10, %s1253_s10   ;;  %s826_s9 = sphi %s913_s9, %s1252_s9   ;;  %s822_s0 = sphi %s911_s0, %s1251_s0   ;;  %s818_s8 = sphi %s909_s8, %s1250_s8   ;;  %s814_s7 = sphi %s907_s7, %s1249_s7   ;;  %s810_s6 = sphi %s905_s6, %s1248_s6   ;;  %s806_s30 = sphi %s903_s30, %s1247_s30   ;;  %s802_s29 = sphi %s901_s29, %s1256_s29   ;;  %s798_s28 = sphi %s899_s28, %s1255_s28  }
  0x16   : > { %1217 = sst [smem:[#allocation21_spill]] %s806_s30  ;;  %s456_s14 = sadd.s32 4294967294, %s838_s12  }
  0x17   : > { %1218 = sst [smem:[#allocation22_spill]] %s814_s7  ;;  %s34_s15 = sadd.s32 1, %s830_s10 }
  0x18   : > { %1219 = sst [smem:[#allocation23_spill]] %s818_s8  ;;  %s37_s16 = sadd.s32 1, %s834_s11 }
  0x19   : > { %1220 = sst [smem:[#allocation24_spill]] %s830_s10  ;;  %p35_p3 = scmp.ge.s32.totalorder %s34_s15, 2 }
  0x1a   : > { %1221 = sst [smem:[#allocation25_spill]] %s834_s11  ;;  %s44_s17 = sadd.s32 1, %s818_s8 }
  0x1b   : > { %1222 = sst [smem:[#allocation26_spill]] %s838_s12  ;;  %p51_p4 = scmp.ne.s32.totalorder %s818_s8, %s814_s7 }
  0x1c   : > { %p52_p5 = scmp.eq.s32.totalorder %s838_s12, 0  ;;  %s1258_s15 = smov (%p35_p3, %s34_s15), 0 }
  0x1d   : > { %1223 = sst [smem:[#allocation27_spill]] %s1258_s15  ;;  %s1260_s16 = smov (!%p35_p3, %s37_s16), %s834_s11 }
  0x1e   : > { %p963_p6 = por %p52_p5, %p51_p4  ;;  %p57_p7 = scmp.ne.s32.totalorder %s814_s7, %s810_s6 }
  0x1f   : > { %p39_p8 = scmp.ge.s32.totalorder %s1260_s16, 2  ;;  %p58_p9 = scmp.eq.s32.totalorder %s455_s13, 0 }
  0x20   : > { %s109_s19 = ssub.s32 %s830_s10, %s1258_s15  ;;  %s114_s20 = sadd.s32 1, %s806_s30 }
  0x21   : > { %s1262_s16 = smov (%p39_p8, %s1260_s16), 0  ;;  %p973_p10 = por %p58_p9, %p57_p7 }
  0x22   : > { %1225 = sst [smem:[#allocation28_spill]] %s1262_s16  ;;  %p124_p11 = scmp.ne.s32.totalorder %s806_s30, %s802_s29 }
  0x23   : > { %s41_s22 = ssub.s32 %s834_s11, %s1262_s16  ;;  %p125_p12 = scmp.eq.s32.totalorder %s455_s13, 3 }
  0x24   : > { %p42_p13 = scmp.eq.s32.totalorder %s41_s22, 0  ;;  %s111_s23 = sor.u32 %s109_s19, %s41_s22 }
  0x25   : > { %p112_p0 = scmp.eq.s32.totalorder %s111_s23, 0  ;;  %p981_p1 = por %p125_p12, %p124_p11 }
  0x26   : > { %s986_s25 = scalar_select %p42_p13, %s818_s8, %s44_s17  }
  0x27   : > { %s1227_s24 = scalar_select %p981_p1, 1, 0 }
  0x28   : > { %1228 = sst [smem:[#allocation29_spill]] %s986_s25  ;;  %p130_p2 = scmp.ne.s32.totalorder %s802_s29, %s798_s28 }
  0x29   : > { %s989_s26 = scalar_select %p112_p0, %s806_s30, %s114_s20  }
  0x2a   : > { %p131_p3 = scmp.eq.s32.totalorder %s456_s14, 3  ;;  %p495_p4 = scmp.lt.s32.totalorder %s838_s12, 4 }
  0x2b   : > { %1229 = sst [smem:[#allocation30_spill]] %s989_s26  ;;  %s157_s6 = sand.u32 1, %s818_s8  }
  0x2c   : > { %p994_p5 = por %p131_p3, %p130_p2  ;;  %s459_s13 = sshll.u32 %s157_s6, 3 }
  0x2d   : > { %s460_s19 = sshll.u32 %s834_s11, 7  ;;  %s1232_s1 = sld [smem:[#allocation32_spill]] }
  0x2e   : > { %s1230_s27 = scalar_select %p994_p5, 1, 0 }
  0x2f   : > { %s161_s17 = scalar_lea.vmem [#allocation6], %s459_s13  ;;  %p1009_p7 = pnand %p495_p4, %p963_p6 }
  0x30   : > { %1231 = sst [smem:[#allocation31_spill]] %s1230_s27  ;;  %s168_s20 = sshll.u32 %s161_s17, 4  ;;  %s1005_s20 = int_to_ptr.vmem [resolvable:$true] %s168_s20 }
  0x31   : > { %s158_s22 = scalar_lea.sflag [#allocation7], %s157_s6  ;;  %p624_p12 = pneg %p1009_p7 }
  0x33   : > { %s1003_s16 = scalar_lea.hbm %s1232_s1, %s460_s19  ;;  %s627_s18 = scalar_lea.hbm %s1232_s1, 256 }
  0x34   : > { %s622_s19 = scalar_lea.hbm %s1003_s16, 128  ;;  %p628_p6 = scmp.lt.u32.totalorder %s1003_s16, %s1232_s1 }
  0x35   : > { %p623_p11 = scmp.ne.s32.totalorder %s1003_s16, %s622_s19  ;;  %p629_p2 = scmp.lt.u32.totalorder %s627_s18, %s622_s19 }
  0x36   : > { %p631_p4 = scmp.lt.u32.totalorder %s622_s19, %s1003_s16 }
  0x37   : > { %p625_p13 = pnand %p624_p12, %p623_p11  ;;  %p630_p3 = por %p629_p2, %p628_p6 }
  0x39   : > { %p626_p0 = pneg %p625_p13  ;;  %p632_p8 = por %p631_p4, %p630_p3 }
  0x3b   : > { %p633_p9 = pnand %p632_p8, %p626_p0 }
  0x3d   : > { %636 = shalt.err (!%p633_p9)
}
  0x3e   : > { %s637_s6 = scalar_lea.vmem %s1005_s20, 128  ;;  %s853_s13 = smov [#allocation6]  }
  0x3f   : > { %p638_p11 = scmp.ne.s32.totalorder %s1005_s20, %s637_s6  ;;  %s642_s23 = sshll.u32 %s853_s13, 4  ;;  %s643_s23 = int_to_ptr.vmem [resolvable:$false] %s642_s23 }
  0x40   : > { %s644_s15 = scalar_lea.vmem %s643_s23, 256  ;;  %p645_p1 = scmp.lt.s32.totalorder %s1005_s20, %s643_s23 }
  0x41   : > { %p640_p13 = pnand %p638_p11, %p624_p12  ;;  %p646_p6 = scmp.lt.s32.totalorder %s644_s15, %s637_s6 }
  0x43   : > { %p641_p5 = pneg %p640_p13  ;;  %p647_p2 = por %p646_p6, %p645_p1 }
  0x45   : > { %p648_p3 = pnand %p647_p2, %p641_p5 }
  0x47   : > { %651 = shalt.err (!%p648_p3)
}
  0x48   : > { %490 = dma.hbm_to_vmem [thread:$0]  (!%p1009_p7), %s1003_s16, 128, %s1005_s20, %s158_s22  }
  0x49   : > { %p1234_p8 = scmp.lt.s32.totalorder %s838_s12, 5  ;;  %p1235_p9 = scmp.ge.s32.totalorder %s838_s12, 1 }
  0x4b   : > { %p174_p12 = pnand %p1235_p9, %p1234_p8 }
  0x4c   : > { %s179_s19 = sand.u32 (!%p174_p12), 1, %s814_s7  }
  0x4d   : > { %177 = sbr.rel (%p174_p12) target bundleno = 389 (0x185), region = 32  ;;  %s1045_s18 = sshll.u32 (!%p174_p12), %s179_s19, 3 }
  0x4e   : > { %s180_s17 = scalar_lea.sflag (!%p174_p12), [#allocation7], %s179_s19 }
  0x54   : > { %787 = dma.done.wait (%p973_p10), %s180_s17, 128  }
  0x55   : > { %789 = vsyncadd (%p973_p10), %s180_s17, 4294967168  ;;  %s1204_s16 = sand.u32 1, %s802_s29   ;;  %s1211_s20 = sshll.u32 %s826_s9, 3 }
  0x56   : > { %s1056_s14 = sshll.u32 %s1204_s16, 3  ;;  %s1059_s22 = sand.u32 1, %s822_s0 }
  0x57   : > { %p465_p1 = scmp.ne.s32.totalorder %s822_s0, 0 }
  0x58   : > { %s1063_s23 = smov (!%p465_p1), 0  }
  0x59   : > { %211 = sbr.rel (%p465_p1) target bundleno = 139 (0x8b), region = 40 }
  0x60 LB: >> { %s218_s21 = sadd.s32 %s842_s23, %s1211_s20  ;;  %s224_s19 = scalar_lea.vmem [#allocation2], %s842_s23  ;;  %s842_s23 = sphi %s1063_s23, %s217_s23  }
  0x61   : >> { %p219_p10 = scmp.lt.s32.totalorder %s218_s21, 15  ;;  %s232_s17 = sshll.u32 %s224_s19, 4  ;;  %s233_s17 = int_to_ptr.vmem [resolvable:$true] %s232_s17 }
  0x62   : >> { %s654_s8 = scalar_lea.hbm %s1199_s4, 1024 }
  0x63   : >> { %s1264_s21 = smov (!%p219_p10, %s218_s21), 15 }
  0x64   : >> { %s221_s15 = sld [smem:[#allocation5 + %s1264_s21]] }
  0x6a   : >> { %s466_s16 = sshll.u32 %s221_s15, 4 }
  0x6b   : >> { %s223_s1 = scalar_lea.hbm %s1199_s4, %s466_s16 }
  0x6c   : >> { %s652_s11 = scalar_lea.hbm %s223_s1, 16  ;;  %p655_p7 = scmp.lt.u32.totalorder %s223_s1, %s1199_s4 }
  0x6d   : >> { %p653_p5 = scmp.ne.s32.totalorder %s223_s1, %s652_s11  ;;  %p656_p0 = scmp.lt.u32.totalorder %s654_s8, %s652_s11 }
  0x6e   : >> { %p658_p11 = scmp.lt.u32.totalorder %s652_s11, %s223_s1 }
  0x6f   : >> { %p657_p4 = por %p656_p0, %p655_p7 }
  0x71   : >> { %p659_p13 = por %p658_p11, %p657_p4 }
  0x73   : >> { %p660_p6 = pnand %p659_p13, %p653_p5 }
  0x75   : >> { %663 = shalt.err (!%p660_p6)  }
  0x76   : >> { %s664_s21 = scalar_lea.vmem %s233_s17, 16  ;;  %s854_s6 = smov [#allocation2]  }
  0x77   : >> { %p665_p2 = scmp.ne.s32.totalorder %s233_s17, %s664_s21  ;;  %s666_s16 = sshll.u32 %s854_s6, 4  ;;  %s667_s16 = int_to_ptr.vmem [resolvable:$false] %s666_s16 }
  0x78   : >> { %s668_s13 = scalar_lea.vmem %s667_s16, 256  ;;  %p669_p3 = scmp.lt.s32.totalorder %s233_s17, %s667_s16 }
  0x79   : >> { %p670_p8 = scmp.lt.s32.totalorder %s668_s13, %s664_s21 }
  0x7b   : >> { %p671_p9 = por %p670_p8, %p669_p3 }
  0x7d   : >> { %p672_p12 = pnand %p671_p9, %p665_p2 }
  0x7f   : >> { %675 = shalt.err (!%p672_p12)  }
  0x80   : >> { %235 = dma.hbm_to_vmem [thread:$0]  %s223_s1, 16, %s233_s17, [#allocation3] }
  0x81   : >> { %s217_s23 = sadd.s32 1, %s842_s23  }
  0x82   : >> { %p214_p1 = scmp.ge.s32.totalorder %s217_s23, 8  }
  0x84   : > { %216 = sbr.rel (!%p214_p1) target bundleno = 96 (0x60), region = 122 }
  0x8b PF: > { %s236_s7 = sadd.s32 1, %s822_s0 }
  0x8c   : > { %p467_p10 = scmp.ge.s32.totalorder %s236_s7, 2 }
  0x8d   : > { %s241_s8 = ssub.s32 (!%p467_p10), 1, %s1059_s22  ;;  %s1086_s10 = smov (!%p467_p10), 0  }
  0x8e   : > { %240 = sbr.rel (%p467_p10) target bundleno = 194 (0xc2), region = 55 }
  0x95 LB: >> { %s481_s1 = sshll.u32 %s822_s0, 4  ;;  %s1236_s20 = sshll.u32 %s826_s9, 3  ;;  %s846_s10 = sphi %s1086_s10, %s247_s10  }
  0x96   : >> { %s248_s11 = sadd.s32 %s846_s10, %s1236_s20  ;;  %s470_s25 = sshll.u32 %s241_s8, 3 }
  0x97   : >> { %p249_p5 = scmp.lt.s32.totalorder %s248_s11, 15  ;;  %s482_s26 = sadd.s32 16, %s481_s1 }
  0x98   : >> { %s257_s23 = sadd.s32 %s846_s10, %s470_s25  ;;  %s259_s30 = scalar_lea.sflag [#allocation3], %s241_s8 }
  0x99   : >> { %s1266_s11 = smov (!%p249_p5, %s248_s11), 15  ;;  %s258_s17 = scalar_lea.vmem [#allocation2], %s257_s23 }
  0x9a   : >> { %s252_s15 = sadd.s32 %s482_s26, %s1266_s11  ;;  %s267_s21 = sshll.u32 %s258_s17, 4  ;;  %s268_s21 = int_to_ptr.vmem [resolvable:$true] %s267_s21 }
  0x9b   : >> { %s253_s19 = sld [smem:[#allocation5 + %s252_s15]]  ;;  %s678_s1 = scalar_lea.hbm %s1199_s4, 1024 }
  0xa1   : >> { %s469_s6 = sshll.u32 %s253_s19, 4 }
  0xa2   : >> { %s255_s7 = scalar_lea.hbm %s1199_s4, %s469_s6 }
  0xa3   : >> { %s676_s27 = scalar_lea.hbm %s255_s7, 16  ;;  %p679_p0 = scmp.lt.u32.totalorder %s255_s7, %s1199_s4 }
  0xa4   : >> { %p677_p7 = scmp.ne.s32.totalorder %s255_s7, %s676_s27  ;;  %p680_p4 = scmp.lt.u32.totalorder %s678_s1, %s676_s27 }
  0xa5   : >> { %p682_p13 = scmp.lt.u32.totalorder %s676_s27, %s255_s7 }
  0xa6   : >> { %p681_p11 = por %p680_p4, %p679_p0 }
  0xa8   : >> { %p683_p6 = por %p682_p13, %p681_p11 }
  0xaa   : >> { %p684_p2 = pnand %p683_p6, %p677_p7 }
  0xac   : >> { %687 = shalt.err (!%p684_p2)  }
  0xad   : >> { %s688_s11 = scalar_lea.vmem %s268_s21, 16  ;;  %s855_s26 = smov [#allocation2]  }
  0xae   : >> { %p689_p3 = scmp.ne.s32.totalorder %s268_s21, %s688_s11  ;;  %s690_s23 = sshll.u32 %s855_s26, 4  ;;  %s691_s23 = int_to_ptr.vmem [resolvable:$false] %s690_s23 }
  0xaf   : >> { %s692_s15 = scalar_lea.vmem %s691_s23, 256  ;;  %p693_p8 = scmp.lt.s32.totalorder %s268_s21, %s691_s23 }
  0xb0   : >> { %p694_p9 = scmp.lt.s32.totalorder %s692_s15, %s688_s11 }
  0xb2   : >> { %p695_p12 = por %p694_p9, %p693_p8 }
  0xb4   : >> { %p696_p1 = pnand %p695_p12, %p689_p3 }
  0xb6   : >> { %699 = shalt.err (!%p696_p1)  }
  0xb7   : >> { %270 = dma.hbm_to_vmem [thread:$0]  %s255_s7, 16, %s268_s21, %s259_s30 }
  0xb8   : >> { %s247_s10 = sadd.s32 1, %s846_s10  }
  0xb9   : >> { %p244_p10 = scmp.ge.s32.totalorder %s247_s10, 8  }
  0xbb   : > { %246 = sbr.rel (!%p244_p10) target bundleno = 149 (0x95), region = 133 }
  0xc2 PF: > { %s848_s28 = smov 0  }
  0xc3 LB: >> { %s277_s12 = scalar_lea.sflag [#allocation3], %s1059_s22  ;;  %s850_s28 = sphi %s848_s28, %s276_s28  }
  0xc4   : >> { %790 = dma.done.wait %s277_s12, 16 }
  0xc5   : >> { %791 = vsyncadd %s277_s12, 4294967280  ;;  %s276_s28 = sadd.s32 1, %s850_s28  }
  0xc6   : >> { %p273_p5 = scmp.ge.s32.totalorder %s276_s28, 8  }
  0xc7   : > { %s471_s30 = sshll.u32 (%p273_p5), %s1059_s22, 3  ;;  %s1237_s27 = scalar_lea.vmem (%p273_p5), [#allocation6], %s1045_s18  ;;  %v472_v14 = vld [vmem:[%s1197_s2] ss:$0 sm:$0xff] (%p273_p5) }
  0xc8   : > { %275 = sbr.rel (!%p273_p5) target bundleno = 195 (0xc3), region = 144  ;;  %v283_v0 = vld [vmem:[%s1237_s27] sm:$0xff] (%p273_p5)  ;;  %s281_s20 = scalar_lea.vmem (%p273_p5), [#allocation2], %s471_s30  ;;  %v473_v16 = vld [vmem:[%s1198_s3] ss:$0 sm:$0xff] (%p273_p5) }
  0xc9   : > { %v282_v1 = vld [vmem:[%s281_s20] sm:$0xff] (%p273_p5)  ;;  %s475_s18 = sshll.u32 (%p273_p5), %s822_s0, 1  ;;  %s1238_s6 = scalar_lea.vmem (%p273_p5), [#allocation9], %s1056_s14 }
  0xca   : > { %v284_v2 = vadd.f32 (%p273_p5), %v283_v0, %v282_v1  ;;  %s328_s22 = sadd.s32 (%p273_p5), %s826_s9, %s475_s18  ;;  %s332_s16 = sshll.u32 (%p273_p5), %s1238_s6, 4  ;;  %s1131_s16 = int_to_ptr.vmem [resolvable:$true] %s332_s16 }
  0xcb   : > { %s476_s21 = sshll.u32 (%p273_p5), %s328_s22, 7  ;;  %s1239_s9 = smov (%p273_p5), %s1238_s6 }
  0xcc   : > { %285 = vadd.xlane.f32.xlu0 (%p273_p5), %v284_v2  ;;  %v288_v3 = vmul.f32 (%p273_p5), %v284_v2, %v284_v2  ;;  %s1129_s7 = scalar_lea.hbm (%p273_p5), %s1200_s5, %s476_s21  ;;  %s1240_s1 = sand.u32 (%p273_p5), 1, %s802_s29  }
  0xcd   : > { %s317_s25 = scalar_lea.sflag (%p273_p5), [#allocation8], %s1240_s1  ;;  %s700_s11 = scalar_lea.vmem (%p273_p5), %s1131_s16, 128 }
  0xce   : > { %p701_p7 = scmp.ne.s32.totalorder (%p273_p5), %s1131_s16, %s700_s11  ;;  %p1241_p0 = scmp.ne.s32.totalorder (%p273_p5), %s1227_s24, 0 }
  0xcf   : > { %s856_s26 = smov [#allocation9]  }
  0xd0   : > { %289 = vadd.xlane.f32.xlu0 %v288_v3  ;;  %p702_p4 = pnand %p701_p7, %p1241_p0  ;;  %s704_s23 = sshll.u32 %s856_s26, 4  ;;  %s705_s23 = int_to_ptr.vmem [resolvable:$false] %s704_s23 }
  0xd1   : > { %s706_s15 = scalar_lea.vmem %s705_s23, 256  ;;  %p707_p13 = scmp.lt.s32.totalorder %s1131_s16, %s705_s23 }
  0xd2   : > { %p703_p11 = pneg %p702_p4  ;;  %p708_p6 = scmp.lt.s32.totalorder %s706_s15, %s700_s11 }
  0xd4   : > { %p709_p2 = por %p708_p6, %p707_p13 }
  0xd6   : > { %p710_p3 = pnand %p709_p2, %p703_p11 }
 0x159   : > { %v286_v4 = vpop.xlane.xlu0 %285 }
 0x15a   : > { %v287_v5 = vmul.f32 0.0078125, %v286_v4 }
 0x15c   : > { %v292_v7 = vmul.f32 %v287_v5, %v287_v5  ;;  %v297_v12 = vsub.f32 %v284_v2, %v287_v5 }
 0x15d   : > { %v290_v6 = vpop.xlane.xlu0 %289 }
 0x15e   : > { %v291_v8 = vmul.f32 0.0078125, %v290_v6 }
 0x160   : > { %v293_v9 = vsub.f32 %v291_v8, %v292_v7 }
 0x162   : > { %v294_v10 = vmax.f32 %v293_v9, 0.0 }
 0x164   : > { %v295_v11 = vadd.f32 1e-12, %v294_v10 }
 0x166   : > { %610 = vrsqrt.f32 %v295_v11 }
 0x170   : > { %v611_v13 = vpop.eup %610 }
 0x171   : > { %v298_v15 = vmul.f32 %v611_v13, %v297_v12 }
 0x173   : > { %v306_v17 = vmul.f32 %v472_v14, %v298_v15 }
 0x175   : > { %v314_v18 = vadd.f32 %v473_v16, %v306_v17 }
 0x177   : > { %315 = vst [vmem:[%s1239_s9] sm:$0xff] %v314_v18 }
 0x178   : > { %713 = shalt.err (!%p710_p3)
}
 0x179   : > { %s714_s14 = scalar_lea.hbm %s1129_s7, 128  ;;  %s718_s30 = scalar_lea.hbm %s1200_s5, 512 }
 0x17a   : > { %p715_p8 = scmp.ne.s32.totalorder %s1129_s7, %s714_s14  ;;  %p719_p1 = scmp.lt.u32.totalorder %s1129_s7, %s1200_s5 }
 0x17b   : > { %p720_p10 = scmp.lt.u32.totalorder %s718_s30, %s714_s14  ;;  %p722_p7 = scmp.lt.u32.totalorder %s714_s14, %s1129_s7 }
 0x17c   : > { %p716_p9 = pnand %p715_p8, %p1241_p0 }
 0x17d   : > { %p721_p5 = por %p720_p10, %p719_p1 }
 0x17e   : > { %p717_p12 = pneg %p716_p9 }
 0x17f   : > { %p723_p4 = por %p722_p7, %p721_p5 }
 0x181   : > { %p724_p11 = pnand %p723_p4, %p717_p12 }
 0x183   : > { %727 = shalt.err (!%p724_p11)
}
 0x184   : > { %485 = dma.vmem_to_hbm [thread:$0]  (%p1241_p0), %s1131_s16, 128, %s1129_s7, %s317_s25  }
 0x185 PF: > { %s1242_s18 = sld [smem:[#allocation26_spill]]  ;;  %s1243_s22 = sld [smem:[#allocation20_spill]] }
 0x186   : > { %s1244_s8 = sld [smem:[#allocation31_spill]] }
 0x18b   : > { %p496_p13 = scmp.ge.s32.totalorder %s1242_s18, 2  ;;  %s344_s10 = sand.u32 1, %s1243_s22  }
 0x18c   : > { %p1245_p6 = scmp.ne.s32.totalorder %s1244_s8, 0  ;;  %s345_s19 = scalar_lea.sflag [#allocation8], %s344_s10 }
 0x18e   : > { %p492_p2 = pnand %p496_p13, %p1245_p6 }
 0x190   : > { %793 = dma.done.wait (!%p492_p2), %s345_s19, 128  }
 0x191   : > { %795 = vsyncadd (!%p492_p2), %s345_s19, 4294967168  ;;  %s25_s12 = sadd.s32 1, %s1242_s18   ;;  %s1246_s17 = sld [smem:[#allocation21_spill]] }
 0x192   : > { %p22_p3 = scmp.ge.s32.totalorder %s25_s12, 6   ;;  %s1247_s30 = sld [smem:[#allocation30_spill]] }
 0x193   : > { %s1248_s6 = sld [smem:[#allocation22_spill]]  ;;  %s1249_s7 = sld [smem:[#allocation23_spill]] }
 0x194   : > { %s1250_s8 = sld [smem:[#allocation29_spill]]  ;;  %s1251_s0 = sld [smem:[#allocation24_spill]] }
 0x195   : > { %s1252_s9 = sld [smem:[#allocation25_spill]]  ;;  %s1253_s10 = sld [smem:[#allocation27_spill]] }
 0x196   : > { %s1254_s11 = sld [smem:[#allocation28_spill]]  ;;  %s1255_s28 = smov %s802_s29 }
 0x197   : > { %s1256_s29 = smov %s1246_s17  ;;  %24 = sbr.rel (!%p22_p3) target bundleno = 21 (0x15), region = 155 }
 0x19e   :  { %350 = vsyncpa [#allocation7], 1 }
 0x19f   :  { %352 = vsyncpa [#allocation7 + $0x1], 1 }
 0x1a0   :  { %353 = vsyncpa [#allocation8], 1 }
 0x1a1   :  { %355 = vsyncpa [#allocation8 + $0x1], 1 }
 0x1a2   :  { %356 = vsyncmov [#allocation3] }
 0x1a5   :  { %s357_s24 = vpop.sfrf %356 }
 0x1a6   :  { %p479_p0 = scmp.ne.s32.totalorder %s357_s24, 0 }
 0x1a8   :  { %361 = shalt.err (%p479_p0)  }
 0x1a9   :  { %363 = vsyncmov [#allocation3 + $0x1] }
 0x1ac   :  { %s364_s21 = vpop.sfrf %363 }
 0x1ad   :  { %p480_p8 = scmp.ne.s32.totalorder %s364_s21, 0 }
 0x1af   :  { %368 = shalt.err (%p480_p8)  }

</bundles_post_ra>
